<compile_context>
chip_gen: v6e
topology: v6e:2x2x1
jax: 0.10.0
libtpu: 0.0.40
codegen_flags: <defaults>
</compile_context>

<pallas_src>
import functools
import numpy as np

import jax
import jax.numpy as jnp
from jax import lax
from jax.experimental import pallas as pl
from jax.experimental.pallas import tpu as pltpu


def make_pe_table(max_len: int, d_model: int) -> jnp.ndarray:
    """Deterministic sin/cos positional-encoding buffer, shape (max_len, 1, d_model)."""
    position = np.arange(max_len, dtype=np.float32)[:, None]
    div_term = np.exp(
        np.arange(0, d_model, 2, dtype=np.float32) * (-np.log(10000.0) / d_model)
    )
    pe = np.zeros((max_len, d_model), dtype=np.float32)
    pe[:, 0::2] = np.sin(position * div_term)
    pe[:, 1::2] = np.cos(position * div_term)
    return jnp.asarray(pe)[:, None, :]  # (max_len, 1, d_model)


def _pe_dropout_kernel(seed_ref, x_ref, pe_ref, o_ref, *,
                       p: float, train: bool, block_rows: int):
    # (tS, B, D) + (tS, 1, D): batch broadcast happens in-register on the VPU.
    y = x_ref[...] + pe_ref[...]

    if train and p > 0.0:
        tS, B, D = y.shape
        # Global element index for this block (distinct per tile / per core).
        r = lax.broadcasted_iota(jnp.int32, y.shape, 0) + pl.program_id(0) * block_rows
        b = lax.broadcasted_iota(jnp.int32, y.shape, 1)
        d = lax.broadcasted_iota(jnp.int32, y.shape, 2)
        idx = ((r * B + b) * D + d).astype(jnp.uint32)

        # Counter-based hash (lowbias32 finalizer) of (seed, idx): plain integer
        # VALU ops, portable to both the TPU backend and the CPU interpreter.
        seed_u = seed_ref[0].astype(jnp.uint32)
        h = idx + seed_u * jnp.uint32(0x9E3779B9)
        h = (h ^ (h >> 16)) * jnp.uint32(0x7FEB352D)
        h = (h ^ (h >> 15)) * jnp.uint32(0x846CA68B)
        h = h ^ (h >> 16)

        # keep iff top 31 bits >= p * 2^31 (signed compare; no float-uniform build).
        h31 = (h >> 1).astype(jnp.int32)
        thresh = jnp.int32(min(int(round(float(p) * (1 << 31))), (1 << 31) - 1))
        keep = h31 >= thresh

        scale = jnp.asarray(1.0 / (1.0 - p), dtype=y.dtype)
        y = jnp.where(keep, y * scale, jnp.zeros_like(y))

    o_ref[...] = y


def _choose_block_rows(S, B, D, itemsize=4, target_bytes=2 * 1024 * 1024):
    # Cap the row tile so 3 streams x 2 buffers x tile stays well under the
    # v7x 64-MiB VMEM budget (default scoped limit is plenty at <= 2 MiB/tile).
    rows = max(1, target_bytes // max(1, B * D * itemsize))
    return int(min(S, rows))


def positional_encoding_forward(x, pe, *, p=0.1, train=True, seed=0, block_rows=None):
    """x: (S, B, D) float32, pe: (max_len, 1, D) float32 -> (S, B, D)."""
    S, B, D = x.shape
    pe_s = pe[:S]  # (S, 1, D) — no batch broadcast materialized in HBM.
    if block_rows is None:
        block_rows = _choose_block_rows(S, B, D, x.dtype.itemsize)
    block_rows = int(min(block_rows, S))
    grid = (pl.cdiv(S, block_rows),)
    seed_arr = jnp.array([seed], dtype=jnp.int32)

    kernel = functools.partial(
        _pe_dropout_kernel, p=float(p), train=bool(train), block_rows=block_rows
    )
    # TODO(synk): input_output_aliases could reuse x's HBM pages, but it donates
    # x; left disabled because callers (and this demo) may reuse x afterwards.
    return pl.pallas_call(
        kernel,
        out_shape=jax.ShapeDtypeStruct((S, B, D), x.dtype),
        grid_spec=pltpu.PrefetchScalarGridSpec(
            num_scalar_prefetch=1,  # dropout seed lands in SMEM
            grid=grid,
            in_specs=[
                pl.BlockSpec((block_rows, B, D), lambda i, seed: (i, 0, 0)),
                pl.BlockSpec((block_rows, 1, D), lambda i, seed: (i, 0, 0)),
            ],
            out_specs=pl.BlockSpec((block_rows, B, D), lambda i, seed: (i, 0, 0)),
        ),
        compiler_params=pltpu.CompilerParams(
            dimension_semantics=("parallel",),  # rows are independent -> megacore on v7x
        ),
    )(seed_arr, x, pe_s)


if __name__ == "__main__":
    # Small shapes consistent with the module: x is (seq, batch, d_model).
    S, B, D = 16, 2, 32
    MAX_LEN = 64
    P_DROP = 0.1

    key = jax.random.PRNGKey(0)
    x = jax.random.normal(key, (S, B, D), dtype=jnp.float32)
    pe = make_pe_table(MAX_LEN, D)
    ref = np.asarray(x) + np.asarray(pe[:S])  # broadcast over batch, same as PyTorch

    # Eval mode (dropout = identity): exact x + pe semantics. block_rows=8 -> grid of 2.
    y_eval = jax.block_until_ready(
        positional_encoding_forward(x, pe, p=P_DROP, train=False, block_rows=8)
    )
    np.testing.assert_allclose(np.asarray(y_eval), ref, rtol=1e-6, atol=1e-6)

    # Train mode: inverted dropout with deterministic in-kernel counter-based mask.
    # TODO(synk): torch.nn.Dropout's RNG stream is not bit-reproducible here; the
    # inverted-dropout semantics (scale by 1/(1-p), zero dropped) are matched.
    y_train = jax.block_until_ready(
        positional_encoding_forward(x, pe, p=P_DROP, train=True, seed=1234, block_rows=8)
    )
    y_np = np.asarray(y_train)
    assert y_np.shape == (S, B, D)
    kept = y_np != 0.0
    # Kept elements are scaled by exactly 1/(1-p); dropped fraction is ~p.
    np.testing.assert_allclose(
        y_np[kept], (ref / (1.0 - P_DROP))[kept], rtol=1e-6, atol=1e-6
    )
    drop_frac = 1.0 - kept.mean()
    assert 0.01 < drop_frac < 0.3, f"unexpected dropout fraction {drop_frac}"

    print("KERNEL_OK")
</pallas_src>

<mosaic_0001>
module attributes {stable_mosaic.version = 11 : i64} {
  func.func @_pe_dropout_kernel(%arg0: i32, %arg1: memref<1xi32, #tpu.memory_space<smem>>, %arg2: memref<8x2x32xf32, #tpu.memory_space<vmem>>, %arg3: memref<8x1x32xf32, #tpu.memory_space<vmem>>, %arg4: memref<8x2x32xf32, #tpu.memory_space<vmem>>) attributes {dimension_semantics = [#tpu.dimension_semantics<parallel>], iteration_bounds = array<i64: 2>, scalar_prefetch = 1 : i64, scratch_operands = 0 : i64, tpu.core_type = #tpu.core_type<tc>, window_params = [{transform_indices = @transform_0, window_bounds = array<i64: 8, 2, 32>}, {transform_indices = @transform_1, window_bounds = array<i64: 8, 1, 32>}, {transform_indices = @transform_2, window_bounds = array<i64: 8, 2, 32>}]} {
    %c0 = arith.constant 0 : index
    %c0_0 = arith.constant 0 : index
    %c0_1 = arith.constant 0 : index
    %0 = vector.load %arg2[%c0, %c0_0, %c0_1] : memref<8x2x32xf32, #tpu.memory_space<vmem>>, vector<8x2x32xf32>
    %c0_2 = arith.constant 0 : index
    %c0_3 = arith.constant 0 : index
    %c0_4 = arith.constant 0 : index
    %1 = vector.load %arg3[%c0_2, %c0_3, %c0_4] : memref<8x1x32xf32, #tpu.memory_space<vmem>>, vector<8x1x32xf32>
    %2 = vector.broadcast %1 : vector<8x1x32xf32> to vector<8x2x32xf32>
    %3 = arith.addf %0, %2 : vector<8x2x32xf32>
    %c0_5 = arith.constant 0 : index
    %c0_6 = arith.constant 0 : index
    %c0_7 = arith.constant 0 : index
    %4 = vector.load %arg4[%c0_5, %c0_6, %c0_7] : memref<8x2x32xf32, #tpu.memory_space<vmem>>, vector<8x2x32xf32>
    tpu.vector_store %arg4[%c0_5, %c0_6, %c0_7], %3 {strides = array<i32>} : memref<8x2x32xf32, #tpu.memory_space<vmem>>, vector<8x2x32xf32>,
    return
  }
  func.func @transform_0(%arg0: i32, %arg1: memref<1xi32, #tpu.memory_space<smem>>) -> (i32, i32, i32) {
    %c0_i32 = arith.constant 0 : i32
    %c0_i32_0 = arith.constant 0 : i32
    %c0_i32_1 = arith.constant 0 : i32
    return %arg0, %c0_i32, %c0_i32_0 : i32, i32, i32
  }
  func.func @transform_1(%arg0: i32, %arg1: memref<1xi32, #tpu.memory_space<smem>>) -> (i32, i32, i32) {
    %c0_i32 = arith.constant 0 : i32
    %c0_i32_0 = arith.constant 0 : i32
    %c0_i32_1 = arith.constant 0 : i32
    return %arg0, %c0_i32, %c0_i32_0 : i32, i32, i32
  }
  func.func @transform_2(%arg0: i32, %arg1: memref<1xi32, #tpu.memory_space<smem>>) -> (i32, i32, i32) {
    %c0_i32 = arith.constant 0 : i32
    %c0_i32_0 = arith.constant 0 : i32
    %c0_i32_1 = arith.constant 0 : i32
    return %arg0, %c0_i32, %c0_i32_0 : i32, i32, i32
  }
}

</mosaic_0001>

<bundles_post_ra>
// kernel: tpu_custom_call.1
= control target key start
LH: loop header
LB: loop body
LE: loop exit
PB: predicated region body
PF: predicated region fallthrough
CT: control target
= control target key end

     0   :  { %9 = vsyncpa [#allocation5], 0  ;;  %s889_s0 = inlined_call_operand.<no memory space> [shape: s32[1], index: 0, kind: input, shape index: {}]   ;;  %s890_s1 = inlined_call_operand.hbm [shape: f32[16,2,32], index: 1, kind: input, shape index: {}]   ;;  %s891_s2 = inlined_call_operand.hbm [shape: f32[16,1,32], index: 2, kind: input, shape index: {}]   ;;  %s892_s3 = inlined_call_operand.hbm [shape: f32[16,2,32], index: 3, kind: output, shape index: {}]  }
   0x1   :  { %11 = vsyncpa [#allocation5 + $0x1], 0 }
   0x2   :  { %12 = vsyncpa [#allocation8], 0 }
   0x3   :  { %14 = vsyncpa [#allocation8 + $0x1], 0 }
   0x4   :  { %15 = vsyncpa [#allocation6], 0 }
   0x5   :  { %17 = vsyncpa [#allocation6 + $0x1], 0  ;;  %s639_s12 = smov 0   ;;  %s641_s13 = smov 0  }
   0x6   :  { %s643_s0 = smov 0   ;;  %s645_s14 = smov 0  }
   0x7 LB: > { %s660_s15 = sadd.s32 4294967295, %s608_s14   ;;  %s398_s16 = sadd.s32 4294967294, %s608_s14   ;;  %s608_s14 = sphi %s645_s14, %s908_s14   ;;  %s604_s0 = sphi %s643_s0, %s907_s0   ;;  %s600_s13 = sphi %s641_s13, %s906_s13   ;;  %s596_s12 = sphi %s639_s12, %s905_s12  }
   0x8   : > { %s664_s17 = sadd.s32 1, %s608_s14   ;;  %s30_s18 = sadd.s32 1, %s604_s0 }
   0x9   : > { %s27_s19 = ssub.s32 %s608_s14, %s664_s17  ;;  %p37_p0 = scmp.ne.s32.totalorder %s604_s0, %s600_s13 }
   0xa   : > { %p28_p1 = scmp.eq.s32.totalorder %s27_s19, 0  ;;  %p38_p2 = scmp.eq.s32.totalorder %s608_s14, 0 }
   0xb   : > { %p43_p3 = scmp.ne.s32.totalorder %s600_s13, %s596_s12  ;;  %p44_p4 = scmp.eq.s32.totalorder %s660_s15, 0 }
   0xc   : > { %s676_s20 = scalar_select %p28_p1, %s604_s0, %s30_s18  }
   0xd   : > { %p678_p5 = por %p38_p2, %p37_p0  ;;  %p682_p6 = por %p44_p4, %p43_p3 }
   0xe   : > { %p93_p7 = scmp.eq.s32.totalorder %s660_s15, 1  ;;  %p99_p8 = scmp.eq.s32.totalorder %s398_s16, 1 }
   0xf   : > { %s896_s22 = scalar_select %p682_p6, 1, 0 }
  0x10   : > { %p444_p10 = scmp.lt.s32.totalorder %s608_s14, 2  ;;  %p689_p11 = por %p93_p7, %p37_p0 }
  0x11   : > { %p693_p12 = por %p99_p8, %p43_p3  ;;  %s698_s25 = sand.u32 1, %s604_s0  }
  0x12   : > { %s897_s23 = scalar_select %p689_p11, 1, 0 }
  0x13   : > { %s898_s24 = scalar_select %p693_p12, 1, 0 }
  0x14   : > { %s424_s26 = sshll.u32 %s608_s14, 8  ;;  %s401_s27 = sshll.u32 %s698_s25, 4 }
  0x15   : > { %s705_s30 = scalar_lea.hbm %s890_s1, %s424_s26  ;;  %s123_s4 = scalar_lea.vmem [#allocation4], %s401_s27 }
  0x16   : > { %s130_s5 = sshll.u32 %s123_s4, 4  ;;  %p709_p13 = pnand %p444_p10, %p678_p5  ;;  %s713_s5 = int_to_ptr.vmem [resolvable:$true] %s130_s5 }
  0x17   : > { %s120_s7 = scalar_lea.sflag [#allocation5], %s698_s25  ;;  %s484_s8 = scalar_lea.hbm %s705_s30, 256 }
  0x18   : > { %p485_p0 = scmp.ne.s32.totalorder %s705_s30, %s484_s8  ;;  %p486_p1 = pneg %p709_p13 }
  0x19   : > { %s489_s11 = scalar_lea.hbm %s890_s1, 512  ;;  %p490_p4 = scmp.lt.s32.totalorder %s705_s30, %s890_s1 }
  0x1a   : > { %p487_p2 = pnand %p486_p1, %p485_p0  ;;  %p491_p5 = scmp.lt.s32.totalorder %s489_s11, %s484_s8 }
  0x1c   : > { %p488_p3 = pneg %p487_p2  ;;  %p492_p7 = por %p491_p5, %p490_p4 }
  0x1e   : > { %p493_p8 = pnand %p492_p7, %p488_p3 }
  0x20   : > { %496 = shalt.err (!%p493_p8)
}
  0x21   : > { %s497_s19 = scalar_lea.vmem %s713_s5, 256  ;;  %s610_s21 = smov [#allocation4]  }
  0x22   : > { %p498_p10 = scmp.ne.s32.totalorder %s713_s5, %s497_s19  ;;  %s502_s26 = sshll.u32 %s610_s21, 4  ;;  %s503_s26 = int_to_ptr.vmem [resolvable:$false] %s502_s26 }
  0x23   : > { %s504_s27 = scalar_lea.vmem %s503_s26, 512  ;;  %p505_p9 = scmp.lt.s32.totalorder %s713_s5, %s503_s26 }
  0x24   : > { %p500_p0 = pnand %p498_p10, %p486_p1  ;;  %p506_p12 = scmp.lt.s32.totalorder %s504_s27, %s497_s19 }
  0x26   : > { %p501_p2 = pneg %p500_p0  ;;  %p507_p11 = por %p506_p12, %p505_p9 }
  0x28   : > { %p508_p4 = pnand %p507_p11, %p501_p2 }
  0x2a   : > { %511 = shalt.err (!%p508_p4)
}
  0x2b   : > { %s611_s28 = smov 32   ;;  %s612_s29 = smov 2  }
  0x2c   : > { %436 = dma.hbm_to_vmem [thread:$0]  (!%p709_p13), %s705_s30, 256, %s713_s5, %s120_s7, %s611_s28, %s611_s28, %s612_s29  }
  0x2d   : > { %p407_p3 = scmp.ge.s32.totalorder %s608_s14, 1  ;;  %p159_p5 = scmp.lt.s32.totalorder %s608_s14, 3 }
  0x2e   : > { %s404_s4 = sshll.u32 %s698_s25, 3  ;;  %s425_s9 = sshll.u32 %s608_s14, 7 }
  0x2f   : > { %p745_p9 = pnand %p407_p3, %p159_p5  ;;  %s144_s10 = scalar_lea.vmem [#allocation7], %s404_s4 }
  0x30   : > { %s151_s11 = sshll.u32 %s144_s10, 4  ;;  %s753_s19 = scalar_lea.hbm %s891_s2, %s425_s9  ;;  %s755_s11 = int_to_ptr.vmem [resolvable:$true] %s151_s11 }
  0x31   : > { %s141_s30 = scalar_lea.sflag [#allocation8], %s698_s25  ;;  %s512_s5 = scalar_lea.hbm %s753_s19, 128 }
  0x32   : > { %p513_p11 = scmp.ne.s32.totalorder %s753_s19, %s512_s5  ;;  %s517_s26 = scalar_lea.hbm %s891_s2, 256 }
  0x33   : > { %p518_p8 = scmp.lt.s32.totalorder %s753_s19, %s891_s2  ;;  %p519_p10 = scmp.lt.s32.totalorder %s517_s26, %s512_s5 }
  0x34   : > { %p515_p12 = pnand %p513_p11, %p486_p1 }
  0x35   : > { %p520_p0 = por %p519_p10, %p518_p8 }
  0x36   : > { %p516_p7 = pneg %p515_p12 }
  0x38   : > { %p521_p2 = pnand %p520_p0, %p516_p7 }
  0x3a   : > { %524 = shalt.err (!%p521_p2)
}
  0x3b   : > { %s525_s29 = scalar_lea.vmem %s755_s11, 128  ;;  %s613_s4 = smov [#allocation7]  }
  0x3c   : > { %p526_p4 = scmp.ne.s32.totalorder %s755_s11, %s525_s29  ;;  %s530_s9 = sshll.u32 %s613_s4, 4  ;;  %s531_s9 = int_to_ptr.vmem [resolvable:$false] %s530_s9 }
  0x3d   : > { %s532_s10 = scalar_lea.vmem %s531_s9, 256  ;;  %p533_p11 = scmp.lt.s32.totalorder %s755_s11, %s531_s9 }
  0x3e   : > { %p528_p3 = pnand %p526_p4, %p486_p1  ;;  %p534_p12 = scmp.lt.s32.totalorder %s532_s10, %s525_s29 }
  0x40   : > { %p529_p5 = pneg %p528_p3  ;;  %p535_p6 = por %p534_p12, %p533_p11 }
  0x42   : > { %p536_p8 = pnand %p535_p6, %p529_p5 }
  0x44   : > { %539 = shalt.err (!%p536_p8)
}
  0x45   : > { %s614_s16 = smov 16   ;;  %s615_s18 = smov 1  }
  0x46   : > { %439 = dma.hbm_to_vmem [thread:$0]  (!%p709_p13), %s753_s19, 128, %s755_s11, %s141_s30, %s614_s16, %s614_s16, %s615_s18  }
  0x47   : > { %163 = sbr.rel (%p745_p9) target bundleno = 112 (0x70), region = 28  ;;  %s785_s5 = sand.u32 (!%p745_p9), 1, %s600_s13  }
  0x48   : > { %s408_s7 = sshll.u32 (!%p745_p9), %s785_s5, 4  ;;  %s166_s21 = scalar_lea.sflag (!%p745_p9), [#allocation5], %s785_s5 }
  0x49   : > { %s789_s26 = scalar_lea.vmem (!%p745_p9), [#allocation4], %s408_s7  ;;  %p901_p6 = scmp.ne.s32.totalorder (!%p745_p9), %s896_s22, 0 }
  0x4c   : > { %583 = dma.done.wait (%p901_p6), %s166_s21, 256  }
  0x4d   : > { %585 = vsyncadd (%p901_p6), %s166_s21, 4294967040  ;;  %s409_s25 = sshll.u32 %s785_s5, 3  ;;  %s175_s6 = scalar_lea.sflag [#allocation8], %s785_s5 }
  0x4e   : > { %s797_s8 = scalar_lea.vmem [#allocation7], %s409_s25 }
  0x4f   : > { %587 = dma.done.wait (%p901_p6), %s175_s6, 128  }
  0x50   : > { %589 = vsyncadd (%p901_p6), %s175_s6, 4294967168  ;;  %vm279_vm0 = vcmask 254976   ;;  %s803_s11 = scalar_lea.vmem [#allocation9], %s408_s7  ;;  %s426_s30 = sshll.u32 %s660_s15, 8  ;;  %v207_v0 = vld [vmem:[%s789_s26] sm:$0x3] }
  0x51   : > { %s302_s19 = sshll.u32 %s803_s11, 4  ;;  %v411_v1 = vld [vmem:[%s797_s8] ss:$0 sm:$0xff]  ;;  %v208_v2 = vld [vmem:[%s789_s26 + $0x2] sm:$0x3]  ;;  %s838_s28 = scalar_lea.hbm %s892_s3, %s426_s30  ;;  %s828_s19 = int_to_ptr.vmem [resolvable:$true] %s302_s19 }
  0x52   : > { %v271_v3 = vadd.f32 %v411_v1, %v207_v0  ;;  %v412_v4 = vld [vmem:[%s797_s8 + $0x1] ss:$0 sm:$0xff]  ;;  %v209_v5 = vld [vmem:[%s789_s26 + $0x4] sm:$0x3]  ;;  %v413_v6 = vld [vmem:[%s797_s8 + $0x2] ss:$0 sm:$0xff] }
  0x53   : > { %v272_v7 = vadd.f32 %v412_v4, %v208_v2  ;;  %v273_v8 = vadd.f32 %v413_v6, %v209_v5  ;;  %v210_v9 = vld [vmem:[%s789_s26 + $0x6] sm:$0x3]  ;;  %v414_v10 = vld [vmem:[%s797_s8 + $0x3] ss:$0 sm:$0xff]  ;;  %v211_v11 = vld [vmem:[%s789_s26 + $0x8] sm:$0x3] }
  0x54   : > { %280 = vst.msk [vmem:[%s803_s11] sm:$0x3] %vm279_vm0, %v271_v3  ;;  %v274_v12 = vadd.f32 %v414_v10, %v210_v9  ;;  %v415_v13 = vld [vmem:[%s797_s8 + $0x4] ss:$0 sm:$0xff]  ;;  %v212_v14 = vld [vmem:[%s789_s26 + $0xa] sm:$0x3] }
  0x55   : > { %v416_v15 = vld [vmem:[%s797_s8 + $0x5] ss:$0 sm:$0xff]  ;;  %281 = vst.msk [vmem:[%s803_s11 + $0x2] sm:$0x3] %vm279_vm0, %v272_v7  ;;  %282 = vst.msk [vmem:[%s803_s11 + $0x4] sm:$0x3] %vm279_vm0, %v273_v8  ;;  %v275_v16 = vadd.f32 %v415_v13, %v211_v11 }
  0x56   : > { %v276_v17 = vadd.f32 %v416_v15, %v212_v14  ;;  %v213_v18 = vld [vmem:[%s789_s26 + $0xc] sm:$0x3]  ;;  %v417_v19 = vld [vmem:[%s797_s8 + $0x6] ss:$0 sm:$0xff]  ;;  %v214_v20 = vld [vmem:[%s789_s26 + $0xe] sm:$0x3] }
  0x57   : > { %283 = vst.msk [vmem:[%s803_s11 + $0x6] sm:$0x3] %vm279_vm0, %v274_v12  ;;  %v277_v21 = vadd.f32 %v417_v19, %v213_v18  ;;  %v418_v22 = vld [vmem:[%s797_s8 + $0x7] ss:$0 sm:$0xff]  ;;  %284 = vst.msk [vmem:[%s803_s11 + $0x8] sm:$0x3] %vm279_vm0, %v275_v16 }
  0x58   : > { %285 = vst.msk [vmem:[%s803_s11 + $0xa] sm:$0x3] %vm279_vm0, %v276_v17  ;;  %v278_v23 = vadd.f32 %v418_v22, %v214_v20  ;;  %s289_s29 = scalar_lea.sflag [#allocation6], %s785_s5  ;;  %s540_s4 = scalar_lea.vmem %s828_s19, 256 }
  0x59   : > { %286 = vst.msk [vmem:[%s803_s11 + $0xc] sm:$0x3] %vm279_vm0, %v277_v21  ;;  %p541_p13 = scmp.ne.s32.totalorder %s828_s19, %s540_s4  ;;  %p902_p1 = scmp.ne.s32.totalorder %s897_s23, 0 }
  0x5a   : > { %287 = vst.msk [vmem:[%s803_s11 + $0xe] sm:$0x3] %vm279_vm0, %v278_v23  ;;  %s616_s15 = smov [#allocation9]  }
  0x5b   : > { %p542_p9 = pnand %p541_p13, %p902_p1  ;;  %s544_s9 = sshll.u32 %s616_s15, 4  ;;  %s545_s9 = int_to_ptr.vmem [resolvable:$false] %s544_s9 }
  0x5c   : > { %s546_s10 = scalar_lea.vmem %s545_s9, 512  ;;  %p547_p10 = scmp.lt.s32.totalorder %s828_s19, %s545_s9 }
  0x5d   : > { %p543_p7 = pneg %p542_p9  ;;  %p548_p0 = scmp.lt.s32.totalorder %s546_s10, %s540_s4 }
  0x5f   : > { %p549_p2 = por %p548_p0, %p547_p10 }
  0x61   : > { %p550_p4 = pnand %p549_p2, %p543_p7 }
  0x63   : > { %553 = shalt.err (!%p550_p4)
}
  0x64   : > { %s554_s16 = scalar_lea.hbm %s838_s28, 256  ;;  %s558_s21 = scalar_lea.hbm %s892_s3, 512 }
  0x65   : > { %p555_p3 = scmp.ne.s32.totalorder %s838_s28, %s554_s16  ;;  %p559_p12 = scmp.lt.s32.totalorder %s838_s28, %s892_s3 }
  0x66   : > { %p560_p8 = scmp.lt.s32.totalorder %s558_s21, %s554_s16 }
  0x67   : > { %p556_p5 = pnand %p555_p3, %p902_p1 }
  0x68   : > { %p561_p6 = por %p560_p8, %p559_p12 }
  0x69   : > { %p557_p11 = pneg %p556_p5 }
  0x6b   : > { %p562_p13 = pnand %p561_p6, %p557_p11 }
  0x6d   : > { %565 = shalt.err (!%p562_p13)
}
  0x6e   : > { %s617_s6 = smov 32   ;;  %s618_s8 = smov 2  }
  0x6f   : > { %431 = dma.vmem_to_hbm [thread:$0]  (%p902_p1), %s828_s19, 256, %s838_s28, %s289_s29, %s617_s6, %s617_s6, %s618_s8  }
  0x70 PF: > { %s317_s11 = sand.u32 1, %s596_s12   ;;  %p903_p9 = scmp.ne.s32.totalorder %s898_s24, 0 }
  0x71   : > { %p904_p7 = scmp.ge.s32.totalorder %s608_s14, 2  ;;  %s318_s30 = scalar_lea.sflag [#allocation6], %s317_s11 }
  0x73   : > { %p441_p10 = pnand %p904_p7, %p903_p9 }
  0x75   : > { %p442_p0 = pneg %p441_p10 }
  0x77   : > { %591 = dma.done.wait (%p442_p0), %s318_s30, 256  }
  0x78   : > { %593 = vsyncadd (%p442_p0), %s318_s30, 4294967040  ;;  %p20_p2 = scmp.ge.s32.totalorder %s664_s17, 4   ;;  %s905_s12 = smov %s600_s13 }
  0x79   : > { %s906_s13 = smov %s604_s0  ;;  %s907_s0 = smov %s676_s20 }
  0x7a   : > { %s908_s14 = smov %s664_s17  ;;  %22 = sbr.rel (!%p20_p2) target bundleno = 7 (0x7), region = 86 }
  0x7f   :  { %323 = vsyncpa [#allocation5], 1 }
  0x80   :  { %325 = vsyncpa [#allocation5 + $0x1], 1 }
  0x81   :  { %326 = vsyncpa [#allocation8], 1 }
  0x82   :  { %328 = vsyncpa [#allocation8 + $0x1], 1 }
  0x83   :  { %329 = vsyncpa [#allocation6], 1 }
  0x84   :  { %331 = vsyncpa [#allocation6 + $0x1], 1 }

</bundles_post_ra>
